<compile_context>
chip_gen: v5e
topology: v5e:2x2
jax: 0.10.0
libtpu: 0.0.40
codegen_flags: <defaults>
</compile_context>

<pallas_src>
import jax
import jax.numpy as jnp
from jax.experimental import pallas as pl
from jax.experimental.pallas import tpu as pltpu

HIDDEN = 256


def critic_kernel(x_ref, w12_ref, b12_ref, w3_ref, b3_ref, w4_ref, b4_ref,
                  out_ref):
    # fused fc1/fc2: [state | action] @ blockdiag(W1, W2) + [b1 | b2], relu
    x = x_ref[...].astype(jnp.bfloat16)
    h12 = jnp.dot(x, w12_ref[...], preferred_element_type=jnp.float32)
    h12 = jnp.maximum(h12 + b12_ref[...], 0.0)

    # fc3: (TB, 512) @ (512, 256) + b3, relu  (the concat is already h12)
    h3 = jnp.dot(h12.astype(jnp.bfloat16), w3_ref[...],
                 preferred_element_type=jnp.float32)
    h3 = jnp.maximum(h3 + b3_ref[...], 0.0)

    # fc4 (N=1): VPU multiply + XLU lane-reduce instead of a 1-wide MXU dot
    out_ref[...] = (jnp.sum(h3 * w4_ref[...].astype(jnp.float32),
                            axis=-1, keepdims=True) + b4_ref[...])


def critic_forward(state, action, params, *, tb=None):
    """state: [B, obs_dim] f32, action: [B, action_dim] f32 -> [B, 1] f32."""
    B = state.shape[0]
    x = jnp.concatenate([state, action], axis=1)          # (B, obs+act)
    in_dim = x.shape[1]

    # batch tile: whole batch if small, otherwise a multiple of 8 sublanes
    if tb is None:
        tb = min(B, 512)
    tb = min(tb, B)
    if tb < B:
        tb = max(8, (tb // 8) * 8)
    grid = (pl.cdiv(B, tb),)

    w12, b12 = params["w12"], params["b12"]
    w3, b3 = params["w3"], params["b3"]
    w4, b4 = params["w4"], params["b4"]

    def resident(arr):
        # whole-array block, same block index at every grid step -> the tile
        # stays VMEM-resident and is only DMA'd from HBM once per call.
        return pl.BlockSpec(arr.shape, lambda i, _nd=arr.ndim: (0,) * _nd)

    flops = 2 * B * (in_dim * 2 * HIDDEN + 2 * HIDDEN * HIDDEN + HIDDEN)
    bytes_accessed = int(
        x.size * x.dtype.itemsize
        + sum(a.size * a.dtype.itemsize for a in (w12, b12, w3, b3, w4, b4))
        + B * 4)

    return pl.pallas_call(
        critic_kernel,
        out_shape=jax.ShapeDtypeStruct((B, 1), jnp.float32),
        grid=grid,
        in_specs=[
            pl.BlockSpec((tb, in_dim), lambda i: (i, 0)),   # activations tiled
            resident(w12), resident(b12),
            resident(w3), resident(b3),
            resident(w4), resident(b4),
        ],
        out_specs=pl.BlockSpec((tb, 1), lambda i: (i, 0)),
        compiler_params=pltpu.CompilerParams(
            dimension_semantics=("parallel",)),
        cost_estimate=pl.CostEstimate(
            flops=flops, transcendentals=0, bytes_accessed=bytes_accessed),
    )(x, w12, b12, w3, b3, w4, b4)


def init_params(key, obs_dim, action_dim):
    """PyTorch-style uniform init U(-1/sqrt(fan_in), 1/sqrt(fan_in)).

    Returns (packed kernel params, f32 master weights for the reference)."""
    keys = jax.random.split(key, 8)

    def uni(k, shape, fan_in):
        bound = 1.0 / (fan_in ** 0.5)
        return jax.random.uniform(k, shape, jnp.float32, -bound, bound)

    w1 = uni(keys[0], (obs_dim, HIDDEN), obs_dim)
    b1 = uni(keys[1], (1, HIDDEN), obs_dim)
    w2 = uni(keys[2], (action_dim, HIDDEN), action_dim)
    b2 = uni(keys[3], (1, HIDDEN), action_dim)
    w3 = uni(keys[4], (2 * HIDDEN, HIDDEN), 2 * HIDDEN)
    b3 = uni(keys[5], (1, HIDDEN), 2 * HIDDEN)
    w4 = uni(keys[6], (HIDDEN, 1), HIDDEN)
    b4 = uni(keys[7], (1, 1), HIDDEN)

    # fused block-diagonal fc1/fc2 weight: (obs+act, 512), bias (1, 512)
    w12 = jnp.zeros((obs_dim + action_dim, 2 * HIDDEN), jnp.float32)
    w12 = w12.at[:obs_dim, :HIDDEN].set(w1)
    w12 = w12.at[obs_dim:, HIDDEN:].set(w2)
    b12 = jnp.concatenate([b1, b2], axis=1)

    params = dict(
        w12=w12.astype(jnp.bfloat16),
        b12=b12,
        w3=w3.astype(jnp.bfloat16),
        b3=b3,
        w4=w4.T.astype(jnp.bfloat16),   # stored (1, 256) for the lane reduce
        b4=b4,
    )
    master = dict(w1=w1, b1=b1, w2=w2, b2=b2, w3=w3, b3=b3, w4=w4, b4=b4)
    return params, master


if __name__ == "__main__":
    key = jax.random.PRNGKey(0)
    B, OBS_DIM, ACTION_DIM, TB = 32, 16, 8, 8   # small demo shapes; grid = 4

    k_params, k_state, k_action = jax.random.split(key, 3)
    params, master = init_params(k_params, OBS_DIM, ACTION_DIM)

    state = jax.random.normal(k_state, (B, OBS_DIM), jnp.float32)
    action = jax.random.normal(k_action, (B, ACTION_DIM), jnp.float32)

    out = critic_forward(state, action, params, tb=TB)
    jax.block_until_ready(out)

    # pure-JAX f32 reference (mirrors the PyTorch forward exactly)
    x1 = jnp.maximum(state @ master["w1"] + master["b1"], 0.0)
    x2 = jnp.maximum(action @ master["w2"] + master["b2"], 0.0)
    xc = jnp.concatenate([x1, x2], axis=1)
    h = jnp.maximum(xc @ master["w3"] + master["b3"], 0.0)
    ref = h @ master["w4"] + master["b4"]

    assert out.shape == (B, 1)
    # weights pass through bf16 inside the kernel -> loose tolerance
    assert jnp.allclose(out, ref, atol=5e-2, rtol=5e-2), "mismatch vs reference"
    print("KERNEL_OK")
</pallas_src>

<mosaic_0001>
module attributes {stable_mosaic.version = 11 : i64} {
  func.func @critic_kernel(%arg0: i32, %arg1: memref<8x24xf32, #tpu.memory_space<vmem>>, %arg2: memref<24x512xbf16, #tpu.memory_space<vmem>>, %arg3: memref<1x512xf32, #tpu.memory_space<vmem>>, %arg4: memref<512x256xbf16, #tpu.memory_space<vmem>>, %arg5: memref<1x256xf32, #tpu.memory_space<vmem>>, %arg6: memref<1x256xbf16, #tpu.memory_space<vmem>>, %arg7: memref<1x1xf32, #tpu.memory_space<vmem>>, %arg8: memref<8x1xf32, #tpu.memory_space<vmem>>) attributes {dimension_semantics = [#tpu.dimension_semantics<parallel>], iteration_bounds = array<i64: 4>, scalar_prefetch = 0 : i64, scratch_operands = 0 : i64, tpu.core_type = #tpu.core_type<tc>, window_params = [{transform_indices = @transform_0, window_bounds = array<i64: 8, 24>}, {pipeline_mode = #tpu.pipeline_mode<synchronous>, transform_indices = @transform_1, window_bounds = array<i64: 24, 512>}, {pipeline_mode = #tpu.pipeline_mode<synchronous>, transform_indices = @transform_2, window_bounds = array<i64: 1, 512>}, {pipeline_mode = #tpu.pipeline_mode<synchronous>, transform_indices = @transform_3, window_bounds = array<i64: 512, 256>}, {pipeline_mode = #tpu.pipeline_mode<synchronous>, transform_indices = @transform_4, window_bounds = array<i64: 1, 256>}, {pipeline_mode = #tpu.pipeline_mode<synchronous>, transform_indices = @transform_5, window_bounds = array<i64: 1, 256>}, {pipeline_mode = #tpu.pipeline_mode<synchronous>, transform_indices = @transform_6, window_bounds = array<i64: 1, 1>}, {transform_indices = @transform_7, window_bounds = array<i64: 8, 1>}]} {
    %c0 = arith.constant 0 : index
    %c0_0 = arith.constant 0 : index
    %0 = vector.load %arg1[%c0, %c0_0] : memref<8x24xf32, #tpu.memory_space<vmem>>, vector<8x24xf32>
    %1 = arith.truncf %0 : vector<8x24xf32> to vector<8x24xbf16>
    %c0_1 = arith.constant 0 : index
    %c0_2 = arith.constant 0 : index
    %2 = vector.load %arg2[%c0_1, %c0_2] : memref<24x512xbf16, #tpu.memory_space<vmem>>, vector<24x512xbf16>
    %cst = arith.constant dense<0.000000e+00> : vector<8x512xf32>
    %3 = tpu.matmul %1, %2, %cst {dimension_numbers = #tpu.dot_dimension_numbers<[1], [0], [0], [1], [0, 0, 1, 1], [], []>} : vector<8x24xbf16>, vector<24x512xbf16>, vector<8x512xf32> -> vector<8x512xf32>
    %c0_3 = arith.constant 0 : index
    %c0_4 = arith.constant 0 : index
    %4 = vector.load %arg3[%c0_3, %c0_4] : memref<1x512xf32, #tpu.memory_space<vmem>>, vector<1x512xf32>
    %5 = vector.broadcast %4 : vector<1x512xf32> to vector<8x512xf32>
    %6 = arith.addf %3, %5 : vector<8x512xf32>
    %cst_5 = arith.constant 0.000000e+00 : f32
    %7 = vector.broadcast %cst_5 : f32 to vector<8x512xf32>
    %8 = arith.maximumf %6, %7 : vector<8x512xf32>
    %9 = arith.truncf %8 : vector<8x512xf32> to vector<8x512xbf16>
    %c0_6 = arith.constant 0 : index
    %c0_7 = arith.constant 0 : index
    %10 = vector.load %arg4[%c0_6, %c0_7] : memref<512x256xbf16, #tpu.memory_space<vmem>>, vector<512x256xbf16>
    %cst_8 = arith.constant dense<0.000000e+00> : vector<8x256xf32>
    %11 = tpu.matmul %9, %10, %cst_8 {dimension_numbers = #tpu.dot_dimension_numbers<[1], [0], [0], [1], [0, 0, 1, 1], [], []>} : vector<8x512xbf16>, vector<512x256xbf16>, vector<8x256xf32> -> vector<8x256xf32>
    %c0_9 = arith.constant 0 : index
    %c0_10 = arith.constant 0 : index
    %12 = vector.load %arg5[%c0_9, %c0_10] : memref<1x256xf32, #tpu.memory_space<vmem>>, vector<1x256xf32>
    %13 = vector.broadcast %12 : vector<1x256xf32> to vector<8x256xf32>
    %14 = arith.addf %11, %13 : vector<8x256xf32>
    %cst_11 = arith.constant 0.000000e+00 : f32
    %15 = vector.broadcast %cst_11 : f32 to vector<8x256xf32>
    %16 = arith.maximumf %14, %15 : vector<8x256xf32>
    %c0_12 = arith.constant 0 : index
    %c0_13 = arith.constant 0 : index
    %17 = vector.load %arg6[%c0_12, %c0_13] : memref<1x256xbf16, #tpu.memory_space<vmem>>, vector<1x256xbf16>
    %18 = arith.extf %17 : vector<1x256xbf16> to vector<1x256xf32>
    %19 = vector.broadcast %18 : vector<1x256xf32> to vector<8x256xf32>
    %20 = arith.mulf %16, %19 : vector<8x256xf32>
    %cst_14 = arith.constant dense<0.000000e+00> : vector<8xf32>
    %21 = vector.multi_reduction <add>, %20, %cst_14 [1] : vector<8x256xf32> to vector<8xf32>
    %22 = vector.shape_cast %21 : vector<8xf32> to vector<8x1xf32>
    %c0_15 = arith.constant 0 : index
    %c0_16 = arith.constant 0 : index
    %23 = vector.load %arg7[%c0_15, %c0_16] : memref<1x1xf32, #tpu.memory_space<vmem>>, vector<1x1xf32>
    %24 = vector.broadcast %23 : vector<1x1xf32> to vector<8x1xf32>
    %25 = arith.addf %22, %24 : vector<8x1xf32>
    %c0_17 = arith.constant 0 : index
    %c0_18 = arith.constant 0 : index
    %26 = vector.load %arg8[%c0_17, %c0_18] : memref<8x1xf32, #tpu.memory_space<vmem>>, vector<8x1xf32>
    tpu.vector_store %arg8[%c0_17, %c0_18], %25 {strides = array<i32>} : memref<8x1xf32, #tpu.memory_space<vmem>>, vector<8x1xf32>,
    return
  }
  func.func @transform_0(%arg0: i32) -> (i32, i32) {
    %c0_i32 = arith.constant 0 : i32
    %c0_i32_0 = arith.constant 0 : i32
    return %arg0, %c0_i32 : i32, i32
  }
  func.func @transform_1(%arg0: i32) -> (i32, i32) {
    %c0_i32 = arith.constant 0 : i32
    %c0_i32_0 = arith.constant 0 : i32
    %c0_i32_1 = arith.constant 0 : i32
    return %c0_i32, %c0_i32_0 : i32, i32
  }
  func.func @transform_2(%arg0: i32) -> (i32, i32) {
    %c0_i32 = arith.constant 0 : i32
    %c0_i32_0 = arith.constant 0 : i32
    %c0_i32_1 = arith.constant 0 : i32
    return %c0_i32, %c0_i32_0 : i32, i32
  }
  func.func @transform_3(%arg0: i32) -> (i32, i32) {
    %c0_i32 = arith.constant 0 : i32
    %c0_i32_0 = arith.constant 0 : i32
    %c0_i32_1 = arith.constant 0 : i32
    return %c0_i32, %c0_i32_0 : i32, i32
  }
  func.func @transform_4(%arg0: i32) -> (i32, i32) {
    %c0_i32 = arith.constant 0 : i32
    %c0_i32_0 = arith.constant 0 : i32
    %c0_i32_1 = arith.constant 0 : i32
    return %c0_i32, %c0_i32_0 : i32, i32
  }
  func.func @transform_5(%arg0: i32) -> (i32, i32) {
    %c0_i32 = arith.constant 0 : i32
    %c0_i32_0 = arith.constant 0 : i32
    %c0_i32_1 = arith.constant 0 : i32
    return %c0_i32, %c0_i32_0 : i32, i32
  }
  func.func @transform_6(%arg0: i32) -> (i32, i32) {
    %c0_i32 = arith.constant 0 : i32
    %c0_i32_0 = arith.constant 0 : i32
    %c0_i32_1 = arith.constant 0 : i32
    return %c0_i32, %c0_i32_0 : i32, i32
  }
  func.func @transform_7(%arg0: i32) -> (i32, i32) {
    %c0_i32 = arith.constant 0 : i32
    %c0_i32_0 = arith.constant 0 : i32
    return %arg0, %c0_i32 : i32, i32
  }
}

</mosaic_0001>

<bundles_post_ra>
// kernel: tpu_custom_call.1
= control target key start
LH: loop header
LB: loop body
LE: loop exit
PB: predicated region body
PF: predicated region fallthrough
CT: control target
= control target key end

     0   :  { %s1540_s0 = inlined_call_operand.vmem [shape: f32[32,24], index: 0, kind: input, shape index: {}]   ;;  %s1541_s1 = inlined_call_operand.vmem [shape: bf16[24,512], index: 1, kind: input, shape index: {}]   ;;  %s1542_s2 = inlined_call_operand.vmem [shape: f32[1,512], index: 2, kind: input, shape index: {}]   ;;  %s1543_s3 = inlined_call_operand.hbm [shape: bf16[512,256], index: 3, kind: input, shape index: {}]   ;;  %s1544_s4 = inlined_call_operand.vmem [shape: f32[1,256], index: 4, kind: input, shape index: {}]   ;;  %s1545_s5 = inlined_call_operand.vmem [shape: bf16[1,256], index: 5, kind: input, shape index: {}]   ;;  %s1546_s6 = inlined_call_operand.<no memory space> [shape: f32[1,1], index: 6, kind: input, shape index: {}]   ;;  %s1547_s7 = inlined_call_operand.vmem [shape: f32[32,1], index: 7, kind: output, shape index: {}]  }
   0x1   :  { %v12_v0 = vstv %s1546_s6 }
   0x2   :  { %13 = vst [vmem:[#allocation2] sm:$0x1] %v12_v0 }
   0x3   :  { %14 = vsyncpa [#allocation4], 0  ;;  %s1466_s26 = smov 0  }
   0x4 LB: > { %s220_s29 = sshll.u32 %s1543_s3, 4  ;;  %s1001_s30 = sadd.s32 4294967295, %s1418_s26   ;;  %s1418_s26 = sphi %s1466_s26, %s20_s26   ;;  %s221_s29 = int_to_ptr.hbm [resolvable:$true] %s220_s29 }
   0x5   : > { %p1003_p0 = scmp.ge.s32.totalorder %s1418_s26, 1  ;;  %p203_p1 = scmp.lt.s32.totalorder %s1418_s26, 5 }
   0x6   : > { %p1364_p2 = scmp.eq.s32.totalorder %s1001_s30, 0  ;;  %s1420_s6 = smov [#allocation3]  }
   0x7   : > { %p204_p3 = pnand %p1003_p0, %p203_p1  ;;  %s222_s8 = sshll.u32 %s1420_s6, 4  ;;  %s223_s8 = int_to_ptr.vmem [resolvable:$true] %s222_s8 }
   0x8   : > { %s1421_s9 = smov 128   ;;  %s1422_s10 = smov 8  }
   0x9   : > { %p1360_p4 = pneg %p204_p3  ;;  %254 = sbr.rel (%p204_p3) target bundleno = 445 (0x1bd), region = 48 }
   0xb   : > { %p1361_p5 = pnand %p1364_p2, %p1360_p4 }
   0xd   : > { %1363 = dma.hbm_to_vmem [thread:$0]  (!%p1361_p5), %s221_s29, 8192, %s223_s8, [#allocation4], %s1421_s9, %s1421_s9, %s1422_s10  }
   0xe   : > { %1413 = dma.done.wait (%p1364_p2), [#allocation4], 8192  }
   0xf   : > { %1415 = vsyncadd (%p1364_p2), [#allocation4], 4294959104  ;;  %p285_p6 = scmp.lt.s32.totalorder %s1001_s30, 3  ;;  %v300_v1 = vld [vmem:[%s1541_s1 + $0x20] sm:$0xff]  ;;  %vm346_vm0 = vcmask 1043456   ;;  %v301_v2 = vld [vmem:[%s1541_s1 + $0x28] sm:$0xff] }
  0x10   : > { %v326_v3 = vunpack.c.l.b16 %v300_v1  ;;  %v327_v4 = vunpack.c.h.b16 %v300_v1  ;;  %v328_v5 = vunpack.c.l.b16 %v301_v2  ;;  %v329_v6 = vunpack.c.h.b16 %v301_v2  ;;  %v1012_v7 = vld [vmem:[%s1541_s1] sm:$0xf]  ;;  %v1290_v8 = vld [vmem:[%s1541_s1 + $0xc] sm:$0xf0]  ;;  %v1288_v9 = vld [vmem:[%s1541_s1 + $0x4] sm:$0xf] }
  0x11   : > { %s1549_s30 = smov (!%p285_p6, %s1001_s30), 3  ;;  %v1014_v10 = vld [vmem:[%s1541_s1 + $0x10] sm:$0xf0]  ;;  %v1020_v11 = vld [vmem:[%s1541_s1 + $0x8] sm:$0xf]  ;;  %v1013_v27 = vor.u32 %v1290_v8, %v1012_v7  ;;  %vm342_vm1 = vcmask 195584  }
  0x12   : > { %s1008_s15 = sshll.u32 %s1549_s30, 3  ;;  %v334_v12 = vpack.c.b16 %v326_v3, %v326_v3  ;;  %v335_v13 = vpack.c.b16 %v327_v4, %v327_v4  ;;  %v336_v14 = vpack.c.b16 %v328_v5, %v328_v5  ;;  %v337_v15 = vpack.c.b16 %v329_v6, %v329_v6  ;;  %v1291_v16 = vld [vmem:[%s1541_s1 + $0x14] sm:$0xf0]  ;;  %v1289_v17 = vld [vmem:[%s1541_s1 + $0xc] sm:$0xf] }
  0x13   : > { %v1022_v18 = vld [vmem:[%s1541_s1 + $0x18] sm:$0xf0]  ;;  %s288_s12 = scalar_lea.vmem %s1540_s0, %s1008_s15  ;;  %v1088_v19 = vld [vmem:[#allocation3 + $0x70] sm:$0xf]  ;;  %v1017_v28 = vor.u32 %v1288_v9, %v1014_v10  ;;  %v1021_v30 = vor.u32 %v1291_v16, %v1020_v11  ;;  %v1080_v32 = vld [vmem:[#allocation3 + $0x60] sm:$0xf]  ;;  %s292_s22 = scalar_lea.vmem %s1547_s7, %s1008_s15 }
  0x14   : > { %v1307_v20 = vld [vmem:[#allocation3 + $0x74] sm:$0xf0]  ;;  %v1152_v21 = vld [vmem:[#allocation3 + $0xf0] sm:$0xf]  ;;  %v348_v22 = vsel %vm346_vm0, %v334_v12, 0  ;;  %v351_v23 = vsel %vm346_vm0, %v335_v13, 0  ;;  %v1025_v31 = vor.u32 %v1289_v17, %v1022_v18 }
  0x15   : > { %v354_v24 = vsel %vm346_vm0, %v336_v14, 0  ;;  %v357_v25 = vsel %vm346_vm0, %v337_v15, 0  ;;  %v1323_v26 = vld [vmem:[#allocation3 + $0xf4] sm:$0xf0]  ;;  %365 = vmatpush.bf16.msra.mxu0 %v348_v22  ;;  %378 = vmatpush.bf16.msra.mxu1 %v351_v23  ;;  %v294_v29 = vld [vmem:[%s288_s12] sm:$0xff]  ;;  %v1089_v34 = vor.u32 %v1307_v20, %v1088_v19  ;;  %vm934_vm2 = vcmask 7168  }
  0x16   : > { %391 = vmatpush.bf16.msra.mxu2 %v354_v24  ;;  %404 = vmatpush.bf16.msra.mxu3 %v357_v25  ;;  %v1216_v33 = vld [vmem:[#allocation3 + $0x170] sm:$0xf]  ;;  %v1153_v35 = vor.u32 %v1323_v26, %v1152_v21  ;;  %v1339_v36 = vld [vmem:[#allocation3 + $0x174] sm:$0xf0]  ;;  %v295_v39 = vpack.c.bf16 %v294_v29, %v294_v29  ;;  %v1305_v40 = vld [vmem:[#allocation3 + $0x64] sm:$0xf0] }
  0x17   : > { %v1280_v37 = vld [vmem:[#allocation3 + $0x1f0] sm:$0xf]  ;;  %v1355_v38 = vld [vmem:[#allocation3 + $0x1f4] sm:$0xf0]  ;;  %v1144_v41 = vld [vmem:[#allocation3 + $0xe0] sm:$0xf]  ;;  %v1217_v43 = vor.u32 %v1339_v36, %v1216_v33  ;;  %v1081_v47 = vor.u32 %v1305_v40, %v1080_v32 }
  0x18   : > { %v1321_v42 = vld [vmem:[#allocation3 + $0xe4] sm:$0xf0]  ;;  %v1281_v44 = vor.u32 %v1355_v38, %v1280_v37  ;;  %v1072_v45 = vld [vmem:[#allocation3 + $0x50] sm:$0xf]  ;;  %v1208_v46 = vld [vmem:[#allocation3 + $0x160] sm:$0xf] }
  0x19   : > { %366 = vmatpush.bf16.msra.mxu0 %v1013_v27  ;;  %379 = vmatpush.bf16.msra.mxu1 %v1017_v28  ;;  %v1145_v48 = vor.u32 %v1321_v42, %v1144_v41  ;;  %v1337_v49 = vld [vmem:[#allocation3 + $0x164] sm:$0xf0]  ;;  %v1272_v50 = vld [vmem:[#allocation3 + $0x1e0] sm:$0xf]  ;;  %v1303_v52 = vld [vmem:[#allocation3 + $0x54] sm:$0xf0] }
  0x1a   : > { %392 = vmatpush.bf16.msra.mxu2 %v1021_v30  ;;  %405 = vmatpush.bf16.msra.mxu3 %v1025_v31  ;;  %v1353_v51 = vld [vmem:[#allocation3 + $0x1e4] sm:$0xf0]  ;;  %v1136_v53 = vld [vmem:[#allocation3 + $0xd0] sm:$0xf]  ;;  %v1319_v54 = vld [vmem:[#allocation3 + $0xd4] sm:$0xf0]  ;;  %v1209_v55 = vor.u32 %v1337_v49, %v1208_v46  ;;  %v1073_v59 = vor.u32 %v1303_v52, %v1072_v45 }
  0x1b   : > { %v1273_v56 = vor.u32 %v1353_v51, %v1272_v50  ;;  %v1064_v57 = vld [vmem:[#allocation3 + $0x40] sm:$0xf]  ;;  %v1200_v58 = vld [vmem:[#allocation3 + $0x150] sm:$0xf]  ;;  %v1137_v60 = vor.u32 %v1319_v54, %v1136_v53  ;;  %v1335_v61 = vld [vmem:[#allocation3 + $0x154] sm:$0xf0] }
  0x1c   : > { %1026 = vmatmul.msk.bf16.vlgmr.msra.gmra.mxu0 %vm342_vm1, %v295_v39  ;;  %1027 = vmatmul.msk.bf16.vlgmr.msra.gmra.mxu1 %vm342_vm1, %v295_v39  ;;  %v1264_v62 = vld [vmem:[#allocation3 + $0x1d0] sm:$0xf]  ;;  %v1351_v63 = vld [vmem:[#allocation3 + $0x1d4] sm:$0xf0]  ;;  %v1301_v0 = vld [vmem:[#allocation3 + $0x44] sm:$0xf0]  ;;  %v1201_v3 = vor.u32 %v1335_v61, %v1200_v58 }
  0x1d   : > { %809 = vmatpush.bf16.msrb.mxu0 %v1089_v34  ;;  %822 = vmatpush.bf16.msrb.mxu1 %v1153_v35  ;;  %v1128_v1 = vld [vmem:[#allocation3 + $0xc0] sm:$0xf]  ;;  %v1317_v2 = vld [vmem:[#allocation3 + $0xc4] sm:$0xf0]  ;;  %v1265_v4 = vor.u32 %v1351_v63, %v1264_v62  ;;  %v1056_v5 = vld [vmem:[#allocation3 + $0x30] sm:$0xf]  ;;  %v1065_v7 = vor.u32 %v1301_v0, %v1064_v57 }
  0x1e   : > { %1028 = vmatmul.msk.bf16.vlgmr.msra.gmra.mxu2 %vm342_vm1, %v295_v39  ;;  %1029 = vmatmul.msk.bf16.vlgmr.msra.gmra.mxu3 %vm342_vm1, %v295_v39  ;;  %v1192_v6 = vld [vmem:[#allocation3 + $0x140] sm:$0xf]  ;;  %v1129_v8 = vor.u32 %v1317_v2, %v1128_v1  ;;  %v1333_v9 = vld [vmem:[#allocation3 + $0x144] sm:$0xf0]  ;;  %v1299_v12 = vld [vmem:[#allocation3 + $0x34] sm:$0xf0] }
  0x1f   : > { %835 = vmatpush.bf16.msrb.mxu2 %v1217_v43  ;;  %848 = vmatpush.bf16.msrb.mxu3 %v1281_v44  ;;  %v1256_v10 = vld [vmem:[#allocation3 + $0x1c0] sm:$0xf]  ;;  %v1349_v11 = vld [vmem:[#allocation3 + $0x1c4] sm:$0xf0]  ;;  %v1120_v13 = vld [vmem:[#allocation3 + $0xb0] sm:$0xf]  ;;  %v1193_v15 = vor.u32 %v1333_v9, %v1192_v6  ;;  %v1057_v19 = vor.u32 %v1299_v12, %v1056_v5 }
  0x20   : > { %v1315_v14 = vld [vmem:[#allocation3 + $0xb4] sm:$0xf0]  ;;  %v1257_v16 = vor.u32 %v1349_v11, %v1256_v10  ;;  %v1048_v17 = vld [vmem:[#allocation3 + $0x20] sm:$0xf]  ;;  %v1184_v18 = vld [vmem:[#allocation3 + $0x130] sm:$0xf] }
  0x21   : > { %810 = vmatpush.bf16.msrb.mxu0 %v1081_v47  ;;  %823 = vmatpush.bf16.msrb.mxu1 %v1145_v48  ;;  %v1121_v20 = vor.u32 %v1315_v14, %v1120_v13  ;;  %v1331_v21 = vld [vmem:[#allocation3 + $0x134] sm:$0xf0]  ;;  %v1248_v22 = vld [vmem:[#allocation3 + $0x1b0] sm:$0xf]  ;;  %v1297_v24 = vld [vmem:[#allocation3 + $0x24] sm:$0xf0] }
  0x22   : > { %v1347_v23 = vld [vmem:[#allocation3 + $0x1b4] sm:$0xf0]  ;;  %v1112_v25 = vld [vmem:[#allocation3 + $0xa0] sm:$0xf]  ;;  %v1313_v26 = vld [vmem:[#allocation3 + $0xa4] sm:$0xf0]  ;;  %v1185_v27 = vor.u32 %v1331_v21, %v1184_v18  ;;  %v1049_v31 = vor.u32 %v1297_v24, %v1048_v17 }
  0x23   : > { %836 = vmatpush.bf16.msrb.mxu2 %v1209_v55  ;;  %849 = vmatpush.bf16.msrb.mxu3 %v1273_v56  ;;  %v1249_v28 = vor.u32 %v1347_v23, %v1248_v22  ;;  %v1040_v29 = vld [vmem:[#allocation3 + $0x10] sm:$0xf]  ;;  %v1176_v30 = vld [vmem:[#allocation3 + $0x120] sm:$0xf]  ;;  %v1113_v32 = vor.u32 %v1313_v26, %v1112_v25  ;;  %v1329_v33 = vld [vmem:[#allocation3 + $0x124] sm:$0xf0] }
  0x24   : > { %v1240_v34 = vld [vmem:[#allocation3 + $0x1a0] sm:$0xf]  ;;  %v1345_v35 = vld [vmem:[#allocation3 + $0x1a4] sm:$0xf0]  ;;  %v1295_v36 = vld [vmem:[#allocation3 + $0x14] sm:$0xf0]  ;;  %v1177_v39 = vor.u32 %v1329_v33, %v1176_v30 }
  0x25   : > { %811 = vmatpush.bf16.msrb.mxu0 %v1073_v59  ;;  %824 = vmatpush.bf16.msrb.mxu1 %v1137_v60  ;;  %v1104_v37 = vld [vmem:[#allocation3 + $0x90] sm:$0xf]  ;;  %v1311_v38 = vld [vmem:[#allocation3 + $0x94] sm:$0xf0]  ;;  %v1241_v40 = vor.u32 %v1345_v35, %v1240_v34  ;;  %v1032_v41 = vld [vmem:[#allocation3] sm:$0xf]  ;;  %v1041_v44 = vor.u32 %v1295_v36, %v1040_v29 }
  0x26   : > { %v1293_v42 = vld [vmem:[#allocation3 + $0x4] sm:$0xf0]  ;;  %v1168_v43 = vld [vmem:[#allocation3 + $0x110] sm:$0xf]  ;;  %v1105_v45 = vor.u32 %v1311_v38, %v1104_v37  ;;  %v1327_v46 = vld [vmem:[#allocation3 + $0x114] sm:$0xf0] }
  0x27   : > { %837 = vmatpush.bf16.msrb.mxu2 %v1201_v3  ;;  %850 = vmatpush.bf16.msrb.mxu3 %v1265_v4  ;;  %v1232_v47 = vld [vmem:[#allocation3 + $0x190] sm:$0xf]  ;;  %v1343_v48 = vld [vmem:[#allocation3 + $0x194] sm:$0xf0]  ;;  %v1096_v49 = vld [vmem:[#allocation3 + $0x80] sm:$0xf]  ;;  %v1169_v55 = vor.u32 %v1327_v46, %v1168_v43  ;;  %v1033_v59 = vor.u32 %v1293_v42, %v1032_v41 }
  0x28   : > { %v1309_v50 = vld [vmem:[#allocation3 + $0x84] sm:$0xf0]  ;;  %v1306_v51 = vld [vmem:[#allocation3 + $0x74] sm:$0xf]  ;;  %v1090_v52 = vld [vmem:[#allocation3 + $0x78] sm:$0xf0]  ;;  %v1233_v56 = vor.u32 %v1343_v48, %v1232_v47 }
  0x29   : > { %812 = vmatpush.bf16.msrb.mxu0 %v1065_v7  ;;  %825 = vmatpush.bf16.msrb.mxu1 %v1129_v8  ;;  %v1322_v53 = vld [vmem:[#allocation3 + $0xf4] sm:$0xf]  ;;  %v1154_v54 = vld [vmem:[#allocation3 + $0xf8] sm:$0xf0]  ;;  %v1160_v57 = vld [vmem:[#allocation3 + $0x100] sm:$0xf]  ;;  %v1097_v60 = vor.u32 %v1309_v50, %v1096_v49  ;;  %v1093_v1 = vor.u32 %v1306_v51, %v1090_v52 }
  0x2a   : > { %v1325_v58 = vld [vmem:[#allocation3 + $0x104] sm:$0xf0]  ;;  %v1304_v61 = vld [vmem:[#allocation3 + $0x64] sm:$0xf]  ;;  %v1224_v62 = vld [vmem:[#allocation3 + $0x180] sm:$0xf]  ;;  %v1157_v2 = vor.u32 %v1322_v53, %v1154_v54 }
  0x2b   : > { %838 = vmatpush.bf16.msrb.mxu2 %v1193_v15  ;;  %851 = vmatpush.bf16.msrb.mxu3 %v1257_v16  ;;  %v1341_v63 = vld [vmem:[#allocation3 + $0x184] sm:$0xf0]  ;;  %v1338_v0 = vld [vmem:[#allocation3 + $0x174] sm:$0xf]  ;;  %v1218_v3 = vld [vmem:[#allocation3 + $0x178] sm:$0xf0]  ;;  %v1161_v9 = vor.u32 %v1325_v58, %v1160_v57 }
  0x2c   : > { %v1354_v4 = vld [vmem:[#allocation3 + $0x1f4] sm:$0xf]  ;;  %v1282_v5 = vld [vmem:[#allocation3 + $0x1f8] sm:$0xf0]  ;;  %v1082_v6 = vld [vmem:[#allocation3 + $0x68] sm:$0xf0]  ;;  %v1225_v10 = vor.u32 %v1341_v63, %v1224_v62  ;;  %v1221_v11 = vor.u32 %v1338_v0, %v1218_v3 }
  0x2d   : > { %813 = vmatpush.bf16.msrb.mxu0 %v1057_v19  ;;  %826 = vmatpush.bf16.msrb.mxu1 %v1121_v20  ;;  %v1320_v7 = vld [vmem:[#allocation3 + $0xe4] sm:$0xf]  ;;  %v1146_v8 = vld [vmem:[#allocation3 + $0xe8] sm:$0xf0]  ;;  %v1285_v12 = vor.u32 %v1354_v4, %v1282_v5  ;;  %v1085_v13 = vor.u32 %v1304_v61, %v1082_v6  ;;  %v1302_v15 = vld [vmem:[#allocation3 + $0x54] sm:$0xf] }
  0x2e   : > { %v1149_v14 = vor.u32 %v1320_v7, %v1146_v8  ;;  %v1074_v16 = vld [vmem:[#allocation3 + $0x58] sm:$0xf0]  ;;  %v1318_v17 = vld [vmem:[#allocation3 + $0xd4] sm:$0xf]  ;;  %v1336_v21 = vld [vmem:[#allocation3 + $0x164] sm:$0xf] }
  0x2f   : > { %839 = vmatpush.bf16.msrb.mxu2 %v1185_v27  ;;  %852 = vmatpush.bf16.msrb.mxu3 %v1249_v28  ;;  %v1077_v18 = vor.u32 %v1302_v15, %v1074_v16  ;;  %v1138_v19 = vld [vmem:[#allocation3 + $0xd8] sm:$0xf0]  ;;  %v1210_v22 = vld [vmem:[#allocation3 + $0x168] sm:$0xf0]  ;;  %v1352_v24 = vld [vmem:[#allocation3 + $0x1e4] sm:$0xf] }
  0x30   : > { %v1141_v20 = vor.u32 %v1318_v17, %v1138_v19  ;;  %v1213_v23 = vor.u32 %v1336_v21, %v1210_v22  ;;  %v1274_v25 = vld [vmem:[#allocation3 + $0x1e8] sm:$0xf0]  ;;  %v1300_v27 = vld [vmem:[#allocation3 + $0x44] sm:$0xf]  ;;  %v1334_v33 = vld [vmem:[#allocation3 + $0x154] sm:$0xf] }
  0x31   : > { %814 = vmatpush.bf16.msrb.mxu0 %v1049_v31  ;;  %827 = vmatpush.bf16.msrb.mxu1 %v1113_v32  ;;  %v1277_v26 = vor.u32 %v1352_v24, %v1274_v25  ;;  %v1066_v28 = vld [vmem:[#allocation3 + $0x48] sm:$0xf0]  ;;  %v1316_v29 = vld [vmem:[#allocation3 + $0xc4] sm:$0xf]  ;;  %v1202_v34 = vld [vmem:[#allocation3 + $0x158] sm:$0xf0] }
  0x32   : > { %v1069_v30 = vor.u32 %v1300_v27, %v1066_v28  ;;  %v1130_v31 = vld [vmem:[#allocation3 + $0xc8] sm:$0xf0]  ;;  %v1350_v35 = vld [vmem:[#allocation3 + $0x1d4] sm:$0xf]  ;;  %v1205_v36 = vor.u32 %v1334_v33, %v1202_v34  ;;  %v1266_v37 = vld [vmem:[#allocation3 + $0x1d8] sm:$0xf0] }
  0x33   : > { %840 = vmatpush.bf16.msrb.mxu2 %v1177_v39  ;;  %853 = vmatpush.bf16.msrb.mxu3 %v1241_v40  ;;  %v1133_v32 = vor.u32 %v1316_v29, %v1130_v31  ;;  %v1269_v38 = vor.u32 %v1350_v35, %v1266_v37  ;;  %v1298_v39 = vld [vmem:[#allocation3 + $0x34] sm:$0xf]  ;;  %v1058_v40 = vld [vmem:[#allocation3 + $0x38] sm:$0xf0]  ;;  %v1194_v46 = vld [vmem:[#allocation3 + $0x148] sm:$0xf0] }
  0x34   : > { %v1061_v41 = vor.u32 %v1298_v39, %v1058_v40  ;;  %v1314_v42 = vld [vmem:[#allocation3 + $0xb4] sm:$0xf]  ;;  %v1122_v43 = vld [vmem:[#allocation3 + $0xb8] sm:$0xf0]  ;;  %v1348_v47 = vld [vmem:[#allocation3 + $0x1c4] sm:$0xf] }
  0x35   : > { %815 = vmatpush.bf16.msrb.mxu0 %v1041_v44  ;;  %828 = vmatpush.bf16.msrb.mxu1 %v1105_v45  ;;  %v1125_v44 = vor.u32 %v1314_v42, %v1122_v43  ;;  %v1332_v45 = vld [vmem:[#allocation3 + $0x144] sm:$0xf]  ;;  %v1258_v49 = vld [vmem:[#allocation3 + $0x1c8] sm:$0xf0]  ;;  %v1330_v57 = vld [vmem:[#allocation3 + $0x134] sm:$0xf] }
  0x36   : > { %v1197_v48 = vor.u32 %v1332_v45, %v1194_v46  ;;  %v1261_v50 = vor.u32 %v1348_v47, %v1258_v49  ;;  %v1296_v51 = vld [vmem:[#allocation3 + $0x24] sm:$0xf]  ;;  %v1050_v52 = vld [vmem:[#allocation3 + $0x28] sm:$0xf0]  ;;  %v1186_v58 = vld [vmem:[#allocation3 + $0x138] sm:$0xf0] }
  0x37   : > { %841 = vmatpush.bf16.msrb.mxu2 %v1169_v55  ;;  %854 = vmatpush.bf16.msrb.mxu3 %v1233_v56  ;;  %v1312_v53 = vld [vmem:[#allocation3 + $0xa4] sm:$0xf]  ;;  %v1053_v54 = vor.u32 %v1296_v51, %v1050_v52  ;;  %v1114_v55 = vld [vmem:[#allocation3 + $0xa8] sm:$0xf0]  ;;  %v1250_v61 = vld [vmem:[#allocation3 + $0x1b8] sm:$0xf0] }
  0x38   : > { %v1117_v56 = vor.u32 %v1312_v53, %v1114_v55  ;;  %v1294_v63 = vld [vmem:[#allocation3 + $0x14] sm:$0xf]  ;;  %v1042_v0 = vld [vmem:[#allocation3 + $0x18] sm:$0xf0]  ;;  %v1328_v4 = vld [vmem:[#allocation3 + $0x124] sm:$0xf] }
  0x39   : > { %816 = vmatpush.bf16.msrb.mxu0 %v1033_v59  ;;  %829 = vmatpush.bf16.msrb.mxu1 %v1097_v60  ;;  %v1346_v59 = vld [vmem:[#allocation3 + $0x1b4] sm:$0xf]  ;;  %v1189_v60 = vor.u32 %v1330_v57, %v1186_v58  ;;  %v1106_v3 = vld [vmem:[#allocation3 + $0x98] sm:$0xf0]  ;;  %v1178_v5 = vld [vmem:[#allocation3 + $0x128] sm:$0xf0] }
  0x3a   : > { %v1253_v62 = vor.u32 %v1346_v59, %v1250_v61  ;;  %v1181_v7 = vor.u32 %v1328_v4, %v1178_v5  ;;  %v1344_v8 = vld [vmem:[#allocation3 + $0x1a4] sm:$0xf]  ;;  %v1326_v17 = vld [vmem:[#allocation3 + $0x114] sm:$0xf]  ;;  %v1234_v21 = vld [vmem:[#allocation3 + $0x198] sm:$0xf0] }
  0x3b   : > { %842 = vmatpush.bf16.msrb.mxu2 %v1161_v9  ;;  %855 = vmatpush.bf16.msrb.mxu3 %v1225_v10  ;;  %v1242_v9 = vld [vmem:[#allocation3 + $0x1a8] sm:$0xf0]  ;;  %v1292_v10 = vld [vmem:[#allocation3 + $0x4] sm:$0xf]  ;;  %v1342_v19 = vld [vmem:[#allocation3 + $0x194] sm:$0xf] }
  0x3c   : > { %v1237_v22 = vor.u32 %v1342_v19, %v1234_v21  ;;  %v1162_v24 = vld [vmem:[#allocation3 + $0x108] sm:$0xf0]  ;;  %v1340_v25 = vld [vmem:[#allocation3 + $0x184] sm:$0xf]  ;;  %v302_v29 = vld [vmem:[%s1542_s2] sm:$0xf] }
  0x3d   : > { %861 = vmatpush.bf16.msra.mxu0 %v1093_v1  ;;  %874 = vmatpush.bf16.msra.mxu1 %v1157_v2  ;;  %v1310_v1 = vld [vmem:[#allocation3 + $0x94] sm:$0xf]  ;;  %v1045_v2 = vor.u32 %v1294_v63, %v1042_v0  ;;  %v1226_v27 = vld [vmem:[#allocation3 + $0x188] sm:$0xf0]  ;;  %v305_v31 = vperm.slane %v302_v29, 1  ;;  %v307_v39 = vperm.slane %v302_v29, 3 }
  0x3e   : > { %v1109_v6 = vor.u32 %v1310_v1, %v1106_v3  ;;  %v1229_v28 = vor.u32 %v1340_v25, %v1226_v27  ;;  %v483_v58 = vld [vmem:[%s1544_s4] sm:$0x3] }
  0x3f   : > { %887 = vmatpush.bf16.msra.mxu2 %v1221_v11  ;;  %900 = vmatpush.bf16.msra.mxu3 %v1285_v12  ;;  %v1245_v11 = vor.u32 %v1344_v8, %v1242_v9  ;;  %v1034_v12 = vld [vmem:[#allocation3 + $0x8] sm:$0xf0]  ;;  %v485_v59 = vperm.slane %v483_v58, 0  ;;  %v915_v5 = vld [vmem:[%s1545_s5] sm:$0x3] }
  0x40   : > { %v1037_v15 = vor.u32 %v1292_v10, %v1034_v12  ;;  %v916_v10 = vunpack.c.l.bf16 %v915_v5 }
  0x41   : > { %862 = vmatpush.bf16.msra.mxu0 %v1085_v13  ;;  %875 = vmatpush.bf16.msra.mxu1 %v1149_v14  ;;  %v1308_v13 = vld [vmem:[#allocation3 + $0x84] sm:$0xf]  ;;  %v1098_v14 = vld [vmem:[#allocation3 + $0x88] sm:$0xf0] }
  0x42   : > { %v1101_v16 = vor.u32 %v1308_v13, %v1098_v14  ;;  %v918_v13 = vperm.slane %v916_v10, 0  ;;  %v919_v14 = vperm.slane %v916_v10, 2 }
  0x43   : > { %888 = vmatpush.bf16.msra.mxu2 %v1213_v23  ;;  %901 = vmatpush.bf16.msra.mxu3 %v1277_v26  ;;  %v1324_v23 = vld [vmem:[#allocation3 + $0x104] sm:$0xf] }
  0x44   : > { %v1165_v26 = vor.u32 %v1324_v23, %v1162_v24  ;;  %v923_v21 = vperm.slane %v919_v14, 0 }
  0x45   : > { %863 = vmatpush.bf16.msra.mxu0 %v1077_v18  ;;  %876 = vmatpush.bf16.msra.mxu1 %v1141_v20  ;;  %v1170_v18 = vld [vmem:[#allocation3 + $0x118] sm:$0xf0] }
  0x46   : > { %v1173_v20 = vor.u32 %v1326_v17, %v1170_v18 }
  0x47   : > { %889 = vmatpush.bf16.msra.mxu2 %v1205_v36  ;;  %902 = vmatpush.bf16.msra.mxu3 %v1269_v38  ;;  %v306_v38 = vperm.slane %v302_v29, 2 }
  0x49   : > { %864 = vmatpush.bf16.msra.mxu0 %v1069_v30  ;;  %877 = vmatpush.bf16.msra.mxu1 %v1133_v32  ;;  %v304_v30 = vperm.slane %v302_v29, 0 }
  0x4b   : > { %890 = vmatpush.bf16.msra.mxu2 %v1197_v48  ;;  %903 = vmatpush.bf16.msra.mxu3 %v1261_v50 }
  0x4d   : > { %865 = vmatpush.bf16.msra.mxu0 %v1061_v41  ;;  %878 = vmatpush.bf16.msra.mxu1 %v1125_v44 }
  0x4f   : > { %891 = vmatpush.bf16.msra.mxu2 %v1189_v60  ;;  %904 = vmatpush.bf16.msra.mxu3 %v1253_v62 }
  0x51   : > { %866 = vmatpush.bf16.msra.mxu0 %v1053_v54  ;;  %879 = vmatpush.bf16.msra.mxu1 %v1117_v56 }
  0x53   : > { %892 = vmatpush.bf16.msra.mxu2 %v1181_v7  ;;  %905 = vmatpush.bf16.msra.mxu3 %v1245_v11 }
  0x55   : > { %867 = vmatpush.bf16.msra.mxu0 %v1045_v2  ;;  %880 = vmatpush.bf16.msra.mxu1 %v1109_v6  ;;  %v486_v2 = vperm.slane %v483_v58, 1 }
  0x57   : > { %893 = vmatpush.bf16.msra.mxu2 %v1173_v20  ;;  %906 = vmatpush.bf16.msra.mxu3 %v1237_v22  ;;  %v922_v20 = vperm.slane %v918_v13, 0 }
  0x59   : > { %868 = vmatpush.bf16.msra.mxu0 %v1037_v15  ;;  %881 = vmatpush.bf16.msra.mxu1 %v1101_v16 }
  0x5b   : > { %894 = vmatpush.bf16.msra.mxu2 %v1165_v26  ;;  %907 = vmatpush.bf16.msra.mxu3 %v1229_v28  ;;  %v1377_v28 = vld [vmem:[#allocation2] ss:$0 sm:$0xff] }
  0x99   : > { %v368_v32 = vpop.f32.mrf.mxu0  ;;  %v381_v33 = vpop.f32.mrf.mxu1 }
  0x9a   : > { %v369_v34 = vadd.f32 %v368_v32, %v304_v30  ;;  %v382_v35 = vadd.f32 %v381_v33, %v305_v31 }
  0x9c   : > { %v411_v36 = vmax.f32 %v369_v34, 0.0  ;;  %v412_v37 = vmax.f32 %v382_v35, 0.0 }
  0x9e   : > { %v415_v40 = vpack.c.bf16 %v411_v36, %v411_v36  ;;  %v416_v41 = vpack.c.bf16 %v412_v37, %v412_v37 }
  0xa0   : > { %817 = vmatmul.bf16.vlgmr.msrb.gmra.mxu0 %v415_v40  ;;  %830 = vmatmul.bf16.vlgmr.msrb.gmra.mxu1 %v416_v41 }
  0xa1   : > { %v394_v42 = vpop.f32.mrf.mxu2  ;;  %v407_v43 = vpop.f32.mrf.mxu3 }
  0xa2   : > { %v395_v44 = vadd.f32 %v394_v42, %v306_v38  ;;  %v408_v45 = vadd.f32 %v407_v43, %v307_v39  ;;  %v370_v46 = vpop.f32.mrf.mxu0  ;;  %v383_v47 = vpop.f32.mrf.mxu1 }
  0xa4   : > { %v413_v48 = vmax.f32 %v395_v44, 0.0  ;;  %v414_v49 = vmax.f32 %v408_v45, 0.0 }
  0xa6   : > { %v417_v50 = vpack.c.bf16 %v413_v48, %v413_v48  ;;  %v418_v51 = vpack.c.bf16 %v414_v49, %v414_v49 }
  0xa8   : > { %843 = vmatmul.bf16.vlgmr.msrb.gmra.mxu2 %v417_v50  ;;  %856 = vmatmul.bf16.vlgmr.msrb.gmra.mxu3 %v418_v51 }
  0xa9   : > { %v396_v52 = vpop.f32.mrf.mxu2  ;;  %v409_v53 = vpop.f32.mrf.mxu3 }
  0xb0   : > { %869 = vmatmul.bf16.vlgmr.msra.gmra.mxu0 %v415_v40  ;;  %882 = vmatmul.bf16.vlgmr.msra.gmra.mxu1 %v416_v41 }
  0xb8   : > { %895 = vmatmul.bf16.vlgmr.msra.gmra.mxu2 %v417_v50  ;;  %908 = vmatmul.bf16.vlgmr.msra.gmra.mxu3 %v418_v51 }
 0x11d   : > { %v818_v54 = vpop.f32.mrf.mxu0  ;;  %v831_v55 = vpop.f32.mrf.mxu1 }
 0x11e   : > { %v819_v62 = vadd.f32 %v818_v54, %v485_v59 }
 0x120   : > { %v832_v1 = vadd.f32 %v831_v55, %v819_v62 }
 0x125   : > { %v820_v56 = vpop.f32.mrf.mxu0  ;;  %v833_v57 = vpop.f32.mrf.mxu1 }
 0x12b   : > { %v844_v60 = vpop.f32.mrf.mxu2  ;;  %v857_v61 = vpop.f32.mrf.mxu3 }
 0x12c   : > { %v845_v6 = vadd.f32 %v844_v60, %v832_v1 }
 0x12d   : > { %v870_v63 = vpop.f32.mrf.mxu0  ;;  %v883_v0 = vpop.f32.mrf.mxu1 }
 0x12e   : > { %v871_v7 = vadd.f32 %v870_v63, %v486_v2  ;;  %v858_v11 = vadd.f32 %v857_v61, %v845_v6 }
 0x130   : > { %v884_v12 = vadd.f32 %v883_v0, %v871_v7  ;;  %v913_v18 = vmax.f32 %v858_v11, 0.0 }
 0x132   : > { %v924_v23 = vmul.f32 %v922_v20, %v913_v18 }
 0x133   : > { %v846_v3 = vpop.f32.mrf.mxu2  ;;  %v859_v4 = vpop.f32.mrf.mxu3 }
 0x135   : > { %v872_v8 = vpop.f32.mrf.mxu0  ;;  %v885_v9 = vpop.f32.mrf.mxu1 }
 0x13b   : > { %v896_v15 = vpop.f32.mrf.mxu2  ;;  %v909_v16 = vpop.f32.mrf.mxu3 }
 0x13c   : > { %v897_v17 = vadd.f32 %v896_v15, %v884_v12 }
 0x13e   : > { %v910_v19 = vadd.f32 %v909_v16, %v897_v17 }
 0x140   : > { %v914_v22 = vmax.f32 %v910_v19, 0.0 }
 0x142   : > { %v925_v24 = vmul.f32 %v923_v21, %v914_v22 }
 0x143   : > { %v898_v25 = vpop.f32.mrf.mxu2  ;;  %v911_v26 = vpop.f32.mrf.mxu3 }
 0x144   : > { %v926_v27 = vadd.f32 %v925_v24, %v924_v23 }
 0x146   : > { %927 = vadd.xlane.f32.xlu0 %v926_v27 }
 0x1b9   : > { %v928_v29 = vpop.xlane.xlu0 %927 }
 0x1ba   : > { %v933_v30 = vadd.f32 %v1377_v28, %v928_v29 }
 0x1bc   : > { %935 = vst.msk [vmem:[%s292_s22] sm:$0xff] %vm934_vm2, %v933_v30 }
 0x1bd PF: > { %s20_s26 = sadd.s32 1, %s1418_s26  }
 0x1be   : > { %p17_p7 = scmp.ge.s32.totalorder %s20_s26, 6  }
 0x1c0   :  { %19 = sbr.rel (!%p17_p7) target bundleno = 4 (0x4), region = 83 }
 0x1c5   :  { %955 = vsyncpa [#allocation4], 1 }
 0x1c6   :  { %957 = vsyncpa [#allocation4 + $0x1], 1 }

</bundles_post_ra>
